<compile_context>
chip_gen: v6e
topology: v6e:2x2x1
jax: 0.10.0
libtpu: 0.0.40
codegen_flags: <defaults>
</compile_context>

<pallas_src>
import jax
import jax.numpy as jnp
from jax.experimental import pallas as pl
from jax.experimental.pallas import tpu as pltpu

NUM_JOINTS = 21                            # MANO hand joints
NUM_VERTS_SUB = 195                        # downsampled mesh vertices
NUM_TOKENS = NUM_JOINTS + NUM_VERTS_SUB    # 216
NUM_VERTS_FULL = 778                       # full MANO mesh vertices
IMG_FEAT_DIM = 2048                        # backbone feature dim (hardcoded in forward)
FEAT_DIM = IMG_FEAT_DIM + 3                # 2051
CAM_HIDDEN = 150
TPAD = 256                                 # token dim padded to a lane multiple
VPAD = 896                                 # 778 vertices + 3 cam columns, padded to 7*128


# ---------------------------------------------------------------------------
# Fused Pallas kernel: encoder stub + mesh upsampling + cam head (per chunk)
# ---------------------------------------------------------------------------
def _metro_fused_kernel(img_ref, ref_ref, wbig_ref, bbig_ref, s_ref, bcam_ref,
                        feat_ref, slab_ref, cam_ref):
    # img_ref:  (3*BB, 1)     per-(batch, channel) image term (2048->3 done in wrapper)
    # ref_ref:  (3*BB, 256)   batch-invariant ref_vertices @ W_enc[:3] + b_enc, tiled/padded
    # wbig_ref: (256, 896)    [ upsampling weight | m_fold^T ] zero-padded
    # bbig_ref: (1, 896)      upsampling bias (zeros in the cam / pad columns)
    # s_ref:    (BB, 3*BB)    cam_param_fc channel-mix selection, S[b, 3b+c] = w1[c]
    # bcam_ref: (1, 3)        folded cam bias
    # feat_ref: (3*BB, 256)   encoder output, channel-major, lane-padded
    # slab_ref: (3*BB, 896)   [ 778 upsampled vertex cols | 3 cam-contraction cols | pad ]
    # cam_ref:  (BB, 3)       camera parameters

    # trans_encoder stub: tanh(batch-invariant token term + per-(batch,channel) image term)
    f = jnp.tanh(ref_ref[...] + img_ref[...])                          # (3*BB, 256)
    feat_ref[...] = f                                                   # dense, unmasked store

    # One MXU pass fuses mesh upsampling and the cam token-contraction.
    big = jnp.dot(f, wbig_ref[...],
                  preferred_element_type=jnp.float32) + bbig_ref[...]   # (3*BB, 896)
    slab_ref[...] = big                                                  # dense, unmasked store

    # cam head: channel mix (cam_param_fc) of the token-contracted columns + folded bias.
    cr = big[:, NUM_VERTS_FULL:NUM_VERTS_FULL + 3]                      # (3*BB, 3)
    cam_ref[...] = (jnp.dot(s_ref[...], cr, preferred_element_type=jnp.float32)
                    + bcam_ref[...])                                     # (BB, 3)


def _choose_chunk(B):
    """Pick (BB, G): BB batch elements per grid step, G grid steps."""
    if B <= 8:
        return B, 1                       # single step; every block == full array shape
    for BB in (32, 16, 8):                # multiples of 8 -> 3*BB divisible by 8
        G = -(-B // BB)
        if G >= 2:                        # keep >= 2 steps so v7x's 2 TCs both work
            return BB, G
    return 8, -(-B // 8)


def _metro_fused_call(img_flat, ref_tile, w_big, b_big, s_mix, bcam_row, BB, G):
    rows = 3 * BB
    feat, slab, cam = pl.pallas_call(
        _metro_fused_kernel,
        out_shape=(
            jax.ShapeDtypeStruct((G * rows, TPAD), jnp.float32),
            jax.ShapeDtypeStruct((G * rows, VPAD), jnp.float32),
            jax.ShapeDtypeStruct((G * BB, 3), jnp.float32),
        ),
        grid=(G,),
        in_specs=[
            pl.BlockSpec((rows, 1), lambda g: (g, 0)),        # img term (per chunk)
            pl.BlockSpec((rows, TPAD), lambda g: (0, 0)),     # ref tile (constant)
            pl.BlockSpec((TPAD, VPAD), lambda g: (0, 0)),     # fused weight (constant)
            pl.BlockSpec((1, VPAD), lambda g: (0, 0)),        # fused bias (constant)
            pl.BlockSpec((BB, rows), lambda g: (0, 0)),       # cam channel-mix (constant)
            pl.BlockSpec((1, 3), lambda g: (0, 0)),           # cam bias (constant)
        ],
        out_specs=(
            pl.BlockSpec((rows, TPAD), lambda g: (g, 0)),
            pl.BlockSpec((rows, VPAD), lambda g: (g, 0)),
            pl.BlockSpec((BB, 3), lambda g: (g, 0)),
        ),
        compiler_params=pltpu.CompilerParams(dimension_semantics=("parallel",)),
    )(img_flat, ref_tile, w_big, b_big, s_mix, bcam_row)
    return feat, slab, cam


# ---------------------------------------------------------------------------
# Full forward (plain-JAX glue around the fused Pallas kernel)
# ---------------------------------------------------------------------------
def metro_hand_forward(images, params, template_joints, template_verts_sub):
    B = images.shape[0]

    # Template reference vertices (mesh_model / mesh_sampler are external;
    # deterministic template tensors passed in already play their role).
    wrist_idx = 0  # cfg.J_NAME.index('Wrist')
    root = template_joints[:, wrist_idx, :]
    t_joints = template_joints - root[:, None, :]
    t_verts_sub = template_verts_sub - root[:, None, :]
    ref_vertices = jnp.concatenate([t_joints, t_verts_sub], axis=1)[0]        # (216, 3)

    # TODO(synk): backbone is an external CNN; stubbed as global-avg-pool + linear to 2048.
    pooled = jnp.mean(images, axis=(2, 3))                                    # (B, C)
    image_feat = pooled @ params["backbone_w"].T + params["backbone_b"]       # (B, 2048)

    enc_w, enc_b = params["enc_w"], params["enc_b"]

    # Batch-invariant encoder term, channel-major, zero-padded to 256 lanes: (3, 256)
    ref_enc_t = (ref_vertices @ enc_w[:3, :]).T + enc_b.reshape(3, 1)         # (3, 216)
    ref_pad = jnp.zeros((3, TPAD), jnp.float32).at[:, :NUM_TOKENS].set(ref_enc_t)

    # 2048 -> 3 image projection done ONCE in XLA (genuine dimensionality reduction).
    img_proj = image_feat @ enc_w[3:, :]                                      # (B, 3)

    # Exact fold of cam_param_fc3 o cam_param_fc2 (no nonlinearity in between).
    m_fold = params["cam_fc3_w"] @ params["cam_fc2_w"]                        # (3, 216)
    bcam_row = (params["cam_fc_b"][0] * jnp.sum(m_fold, axis=1)
                + params["cam_fc3_w"] @ params["cam_fc2_b"]
                + params["cam_fc3_b"]).reshape(1, 3)                          # (1, 3)

    # Fused weight: columns [0:778] = upsampling (only vertex-sub token rows),
    # columns [778:781] = m_fold^T (cam token contraction), rest zero-padded.
    wup_t = params["upsampling_w"].T                                          # (195, 778)
    w_big = jnp.zeros((TPAD, VPAD), jnp.float32)
    w_big = w_big.at[NUM_JOINTS:NUM_TOKENS, :NUM_VERTS_FULL].set(wup_t)
    w_big = w_big.at[:NUM_TOKENS, NUM_VERTS_FULL:NUM_VERTS_FULL + 3].set(m_fold.T)
    b_big = jnp.zeros((1, VPAD), jnp.float32)
    b_big = b_big.at[0, :NUM_VERTS_FULL].set(params["upsampling_b"])

    # Batch chunking.
    BB, G = _choose_chunk(B)
    B_pad = BB * G
    ref_tile = jnp.tile(ref_pad, (BB, 1))                                     # (3*BB, 256)
    # cam_param_fc channel-mix selection matrix: S[b, 3b+c] = w1[c]
    s_mix = jnp.kron(jnp.eye(BB, dtype=jnp.float32),
                     params["cam_fc_w"].reshape(1, 3))                        # (BB, 3*BB)

    img_flat = img_proj.reshape(B * 3, 1)                                     # row 3b+c = proj[b, c]
    if B_pad != B:
        img_flat = jnp.pad(img_flat, ((0, (B_pad - B) * 3), (0, 0)))

    # is_train=False path (no meta_masks), output_attentions=False path.
    # TODO(synk): the real METRO trans_encoder is an external multi-block BERT
    # stack; here it is a deterministic tanh(linear) projection 2051 -> 3.
    feat, slab, cam = _metro_fused_call(img_flat, ref_tile, w_big, b_big,
                                        s_mix, bcam_row, BB, G)

    features_enc = feat[:B * 3, :NUM_TOKENS].reshape(B, 3, NUM_TOKENS)
    features_enc = jnp.transpose(features_enc, (0, 2, 1))                     # (B, 216, 3)
    pred_3d_joints = features_enc[:, :NUM_JOINTS, :]                          # (B, 21, 3)
    pred_vertices_sub = features_enc[:, NUM_JOINTS:, :]                       # (B, 195, 3)
    pred_vertices = slab[:B * 3, :NUM_VERTS_FULL].reshape(B, 3, NUM_VERTS_FULL)
    pred_vertices = jnp.transpose(pred_vertices, (0, 2, 1))                   # (B, 778, 3)
    # torch-faithful .squeeze(): (B,3) for B>1, (3,) for B==1
    cam_param = jnp.squeeze(cam[:B])
    return cam_param, pred_3d_joints, pred_vertices_sub, pred_vertices


def reference_forward(images, params, template_joints, template_verts_sub):
    """Plain-JAX reference mirroring the PyTorch forward (for validation)."""
    B = images.shape[0]
    root = template_joints[:, 0, :]
    t_joints = template_joints - root[:, None, :]
    t_verts_sub = template_verts_sub - root[:, None, :]
    ref_vertices = jnp.broadcast_to(
        jnp.concatenate([t_joints, t_verts_sub], axis=1), (B, NUM_TOKENS, 3))
    pooled = jnp.mean(images, axis=(2, 3))
    image_feat = pooled @ params["backbone_w"].T + params["backbone_b"]
    image_feat = jnp.broadcast_to(image_feat[:, None, :], (B, NUM_TOKENS, IMG_FEAT_DIM))
    features = jnp.concatenate([ref_vertices, image_feat], axis=2)
    feats = jnp.tanh(features @ params["enc_w"] + params["enc_b"])
    pred_3d_joints = feats[:, :NUM_JOINTS, :]
    pred_vertices_sub = feats[:, NUM_JOINTS:, :]
    x = feats @ params["cam_fc_w"].T + params["cam_fc_b"]
    x = jnp.swapaxes(x, 1, 2)
    x = x @ params["cam_fc2_w"].T + params["cam_fc2_b"]
    x = x @ params["cam_fc3_w"].T + params["cam_fc3_b"]
    cam_param = jnp.squeeze(jnp.swapaxes(x, 1, 2))
    tt = jnp.swapaxes(pred_vertices_sub, 1, 2)
    pv = tt @ params["upsampling_w"].T + params["upsampling_b"]
    pred_vertices = jnp.swapaxes(pv, 1, 2)
    return cam_param, pred_3d_joints, pred_vertices_sub, pred_vertices


# ---------------------------------------------------------------------------
# Deterministic parameter init (shapes from the module's __init__)
# ---------------------------------------------------------------------------
def init_params(key, in_channels):
    ks = jax.random.split(key, 6)

    def lin(k, out_f, in_f, scale=0.02):
        kw, kb = jax.random.split(k)
        w = jax.random.normal(kw, (out_f, in_f), jnp.float32) * scale
        b = jax.random.normal(kb, (out_f,), jnp.float32) * scale
        return w, b

    p = {}
    p["upsampling_w"], p["upsampling_b"] = lin(ks[0], NUM_VERTS_FULL, NUM_VERTS_SUB)
    p["cam_fc_w"], p["cam_fc_b"] = lin(ks[1], 1, 3)
    p["cam_fc2_w"], p["cam_fc2_b"] = lin(ks[2], CAM_HIDDEN, NUM_TOKENS)
    p["cam_fc3_w"], p["cam_fc3_b"] = lin(ks[3], 3, CAM_HIDDEN)
    # external stubs (backbone + trans_encoder)
    p["backbone_w"], p["backbone_b"] = lin(ks[4], IMG_FEAT_DIM, in_channels)
    kew, keb = jax.random.split(ks[5])
    p["enc_w"] = jax.random.normal(kew, (FEAT_DIM, 3), jnp.float32) * 0.02
    p["enc_b"] = jax.random.normal(keb, (3,), jnp.float32) * 0.02
    return p


if __name__ == "__main__":
    key = jax.random.PRNGKey(0)
    kimg, ktj, ktv, kparams = jax.random.split(key, 4)

    B, C, H, W = 2, 3, 16, 16
    images = jax.random.normal(kimg, (B, C, H, W), jnp.float32)               # NCHW
    template_joints = jax.random.normal(ktj, (1, NUM_JOINTS, 3), jnp.float32) * 0.1
    template_verts_sub = jax.random.normal(ktv, (1, NUM_VERTS_SUB, 3), jnp.float32) * 0.1
    params = init_params(kparams, C)

    outs = metro_hand_forward(images, params, template_joints, template_verts_sub)
    outs = jax.block_until_ready(outs)
    cam_param, pred_3d_joints, pred_vertices_sub, pred_vertices = outs

    assert cam_param.shape == (B, 3)
    assert pred_3d_joints.shape == (B, NUM_JOINTS, 3)
    assert pred_vertices_sub.shape == (B, NUM_VERTS_SUB, 3)
    assert pred_vertices.shape == (B, NUM_VERTS_FULL, 3)

    ref = reference_forward(images, params, template_joints, template_verts_sub)
    for got, want in zip(outs, ref):
        assert jnp.allclose(got, want, atol=1e-4, rtol=1e-4), float(jnp.abs(got - want).max())

    print("KERNEL_OK")
</pallas_src>

<mosaic_0001>
module attributes {stable_mosaic.version = 11 : i64} {
  func.func @_metro_fused_kernel(%arg0: i32, %arg1: memref<6x1xf32, #tpu.memory_space<vmem>>, %arg2: memref<6x256xf32, #tpu.memory_space<vmem>>, %arg3: memref<256x896xf32, #tpu.memory_space<vmem>>, %arg4: memref<1x896xf32, #tpu.memory_space<vmem>>, %arg5: memref<2x6xf32, #tpu.memory_space<vmem>>, %arg6: memref<1x3xf32, #tpu.memory_space<vmem>>, %arg7: memref<6x256xf32, #tpu.memory_space<vmem>>, %arg8: memref<6x896xf32, #tpu.memory_space<vmem>>, %arg9: memref<2x3xf32, #tpu.memory_space<vmem>>) attributes {dimension_semantics = [#tpu.dimension_semantics<parallel>], iteration_bounds = array<i64: 1>, scalar_prefetch = 0 : i64, scratch_operands = 0 : i64, tpu.core_type = #tpu.core_type<tc>, window_params = [{transform_indices = @transform_0, window_bounds = array<i64: 6, 1>}, {pipeline_mode = #tpu.pipeline_mode<synchronous>, transform_indices = @transform_1, window_bounds = array<i64: 6, 256>}, {pipeline_mode = #tpu.pipeline_mode<synchronous>, transform_indices = @transform_2, window_bounds = array<i64: 256, 896>}, {pipeline_mode = #tpu.pipeline_mode<synchronous>, transform_indices = @transform_3, window_bounds = array<i64: 1, 896>}, {pipeline_mode = #tpu.pipeline_mode<synchronous>, transform_indices = @transform_4, window_bounds = array<i64: 2, 6>}, {pipeline_mode = #tpu.pipeline_mode<synchronous>, transform_indices = @transform_5, window_bounds = array<i64: 1, 3>}, {transform_indices = @transform_6, window_bounds = array<i64: 6, 256>}, {transform_indices = @transform_7, window_bounds = array<i64: 6, 896>}, {transform_indices = @transform_8, window_bounds = array<i64: 2, 3>}]} {
    %c0 = arith.constant 0 : index
    %c0_0 = arith.constant 0 : index
    %0 = vector.load %arg2[%c0, %c0_0] : memref<6x256xf32, #tpu.memory_space<vmem>>, vector<6x256xf32>
    %c0_1 = arith.constant 0 : index
    %c0_2 = arith.constant 0 : index
    %1 = vector.load %arg1[%c0_1, %c0_2] : memref<6x1xf32, #tpu.memory_space<vmem>>, vector<6x1xf32>
    %2 = vector.broadcast %1 : vector<6x1xf32> to vector<6x256xf32>
    %3 = arith.addf %0, %2 : vector<6x256xf32>
    %4 = math.tanh %3 : vector<6x256xf32>
    %c0_3 = arith.constant 0 : index
    %c0_4 = arith.constant 0 : index
    %5 = vector.load %arg7[%c0_3, %c0_4] : memref<6x256xf32, #tpu.memory_space<vmem>>, vector<6x256xf32>
    tpu.vector_store %arg7[%c0_3, %c0_4], %4 {strides = array<i32>} : memref<6x256xf32, #tpu.memory_space<vmem>>, vector<6x256xf32>,
    %c0_5 = arith.constant 0 : index
    %c0_6 = arith.constant 0 : index
    %6 = vector.load %arg3[%c0_5, %c0_6] : memref<256x896xf32, #tpu.memory_space<vmem>>, vector<256x896xf32>
    %cst = arith.constant dense<0.000000e+00> : vector<6x896xf32>
    %7 = tpu.matmul %4, %6, %cst {dimension_numbers = #tpu.dot_dimension_numbers<[1], [0], [0], [1], [0, 0, 1, 1], [], []>} : vector<6x256xf32>, vector<256x896xf32>, vector<6x896xf32> -> vector<6x896xf32>
    %c0_7 = arith.constant 0 : index
    %c0_8 = arith.constant 0 : index
    %8 = vector.load %arg4[%c0_7, %c0_8] : memref<1x896xf32, #tpu.memory_space<vmem>>, vector<1x896xf32>
    %9 = vector.broadcast %8 : vector<1x896xf32> to vector<6x896xf32>
    %10 = arith.addf %7, %9 : vector<6x896xf32>
    %c0_9 = arith.constant 0 : index
    %c0_10 = arith.constant 0 : index
    %11 = vector.load %arg8[%c0_9, %c0_10] : memref<6x896xf32, #tpu.memory_space<vmem>>, vector<6x896xf32>
    tpu.vector_store %arg8[%c0_9, %c0_10], %10 {strides = array<i32>} : memref<6x896xf32, #tpu.memory_space<vmem>>, vector<6x896xf32>,
    %12 = vector.extract_strided_slice %10 {offsets = [0, 778], sizes = [6, 3], strides = [1, 1]} : vector<6x896xf32> to vector<6x3xf32>
    %c0_11 = arith.constant 0 : index
    %c0_12 = arith.constant 0 : index
    %13 = vector.load %arg5[%c0_11, %c0_12] : memref<2x6xf32, #tpu.memory_space<vmem>>, vector<2x6xf32>
    %cst_13 = arith.constant dense<0.000000e+00> : vector<2x3xf32>
    %14 = tpu.matmul %13, %12, %cst_13 {dimension_numbers = #tpu.dot_dimension_numbers<[1], [0], [0], [1], [0, 0, 1, 1], [], []>} : vector<2x6xf32>, vector<6x3xf32>, vector<2x3xf32> -> vector<2x3xf32>
    %c0_14 = arith.constant 0 : index
    %c0_15 = arith.constant 0 : index
    %15 = vector.load %arg6[%c0_14, %c0_15] : memref<1x3xf32, #tpu.memory_space<vmem>>, vector<1x3xf32>
    %16 = vector.broadcast %15 : vector<1x3xf32> to vector<2x3xf32>
    %17 = arith.addf %14, %16 : vector<2x3xf32>
    %c0_16 = arith.constant 0 : index
    %c0_17 = arith.constant 0 : index
    %18 = vector.load %arg9[%c0_16, %c0_17] : memref<2x3xf32, #tpu.memory_space<vmem>>, vector<2x3xf32>
    tpu.vector_store %arg9[%c0_16, %c0_17], %17 {strides = array<i32>} : memref<2x3xf32, #tpu.memory_space<vmem>>, vector<2x3xf32>,
    return
  }
  func.func @transform_0(%arg0: i32) -> (i32, i32) {
    %c0_i32 = arith.constant 0 : i32
    %c0_i32_0 = arith.constant 0 : i32
    return %arg0, %c0_i32 : i32, i32
  }
  func.func @transform_1(%arg0: i32) -> (i32, i32) {
    %c0_i32 = arith.constant 0 : i32
    %c0_i32_0 = arith.constant 0 : i32
    %c0_i32_1 = arith.constant 0 : i32
    return %c0_i32, %c0_i32_0 : i32, i32
  }
  func.func @transform_2(%arg0: i32) -> (i32, i32) {
    %c0_i32 = arith.constant 0 : i32
    %c0_i32_0 = arith.constant 0 : i32
    %c0_i32_1 = arith.constant 0 : i32
    return %c0_i32, %c0_i32_0 : i32, i32
  }
  func.func @transform_3(%arg0: i32) -> (i32, i32) {
    %c0_i32 = arith.constant 0 : i32
    %c0_i32_0 = arith.constant 0 : i32
    %c0_i32_1 = arith.constant 0 : i32
    return %c0_i32, %c0_i32_0 : i32, i32
  }
  func.func @transform_4(%arg0: i32) -> (i32, i32) {
    %c0_i32 = arith.constant 0 : i32
    %c0_i32_0 = arith.constant 0 : i32
    %c0_i32_1 = arith.constant 0 : i32
    return %c0_i32, %c0_i32_0 : i32, i32
  }
  func.func @transform_5(%arg0: i32) -> (i32, i32) {
    %c0_i32 = arith.constant 0 : i32
    %c0_i32_0 = arith.constant 0 : i32
    %c0_i32_1 = arith.constant 0 : i32
    return %c0_i32, %c0_i32_0 : i32, i32
  }
  func.func @transform_6(%arg0: i32) -> (i32, i32) {
    %c0_i32 = arith.constant 0 : i32
    %c0_i32_0 = arith.constant 0 : i32
    return %arg0, %c0_i32 : i32, i32
  }
  func.func @transform_7(%arg0: i32) -> (i32, i32) {
    %c0_i32 = arith.constant 0 : i32
    %c0_i32_0 = arith.constant 0 : i32
    return %arg0, %c0_i32 : i32, i32
  }
  func.func @transform_8(%arg0: i32) -> (i32, i32) {
    %c0_i32 = arith.constant 0 : i32
    %c0_i32_0 = arith.constant 0 : i32
    return %arg0, %c0_i32 : i32, i32
  }
}

</mosaic_0001>

<bundles_post_ra>
// kernel: tpu_custom_call.1
= control target key start
LH: loop header
LB: loop body
LE: loop exit
PB: predicated region body
PF: predicated region fallthrough
CT: control target
= control target key end

     0   :  { %14 = vsyncpa [#allocation3], 0  ;;  %s1011_s0 = inlined_call_operand.vmem [shape: f32[6,1], index: 0, kind: input, shape index: {}]   ;;  %s1012_s1 = inlined_call_operand.hbm [shape: f32[6,256], index: 1, kind: input, shape index: {}]   ;;  %s1013_s2 = inlined_call_operand.hbm [shape: f32[256,896], index: 2, kind: input, shape index: {}]   ;;  %s1014_s3 = inlined_call_operand.vmem [shape: f32[1,896], index: 3, kind: input, shape index: {}]   ;;  %s1015_s4 = inlined_call_operand.vmem [shape: f32[2,6], index: 4, kind: input, shape index: {}]   ;;  %s1016_s5 = inlined_call_operand.vmem [shape: f32[1,3], index: 5, kind: input, shape index: {}]   ;;  %s1017_s6 = inlined_call_operand.hbm [shape: f32[6,256], index: 6, kind: output, shape index: {0}]   ;;  %s1018_s7 = inlined_call_operand.hbm [shape: f32[6,896], index: 7, kind: output, shape index: {1}]   ;;  %s1019_s8 = inlined_call_operand.hbm [shape: f32[2,3], index: 8, kind: output, shape index: {2}]  }
   0x1   :  { %15 = vsyncpa [#allocation6], 0 }
   0x2   :  { %16 = vsyncpa [#allocation4], 0 }
   0x3   :  { %17 = vsyncpa [#allocation9], 0  ;;  %s921_s27 = smov [#allocation2]   ;;  %s922_s29 = smov [#allocation5]  }
   0x4   :  { %s26_s28 = sshll.u32 %s921_s27, 4  ;;  %s35_s30 = sshll.u32 %s922_s29, 4  ;;  %s27_s28 = int_to_ptr.vmem [resolvable:$true] %s26_s28  ;;  %s36_s30 = int_to_ptr.vmem [resolvable:$true] %s35_s30 }
   0x5   :  { %s821_s9 = scalar_lea.vmem %s27_s28, 256  ;;  %p826_p1 = scmp.lt.s32.totalorder %s27_s28, %s27_s28 }
   0x6   :  { %p822_p0 = scmp.ne.s32.totalorder %s27_s28, %s821_s9  ;;  %p827_p2 = scmp.lt.s32.totalorder %s821_s9, %s821_s9 }
   0x8   :  { %p828_p3 = por %p827_p2, %p826_p1 }
   0xa   :  { %p829_p4 = pnand %p828_p3, %p822_p0 }
   0xc   :  { %832 = shalt.err (!%p829_p4)
}
   0xd   :  { %29 = dma.hbm_to_vmem [thread:$0]  %s1012_s1, 256, %s27_s28, [#allocation3]  }
   0xe   :  { %s841_s12 = scalar_lea.vmem %s36_s30, 28672  ;;  %p846_p6 = scmp.lt.s32.totalorder %s36_s30, %s36_s30 }
   0xf   :  { %p842_p5 = scmp.ne.s32.totalorder %s36_s30, %s841_s12  ;;  %p847_p7 = scmp.lt.s32.totalorder %s841_s12, %s841_s12 }
  0x11   :  { %p848_p8 = por %p847_p7, %p846_p6 }
  0x13   :  { %p849_p9 = pnand %p848_p8, %p842_p5 }
  0x15   :  { %852 = shalt.err (!%p849_p9)
}
  0x16   :  { %s923_s13 = smov 896   ;;  %s924_s14 = smov 56  }
  0x17   :  { %41 = dma.hbm_to_vmem [thread:$0]  %s1013_s2, 28672, %s36_s30, [#allocation6], %s923_s13, %s923_s13, %s924_s14  }
  0x18   :  { %913 = dma.done.wait [#allocation3], 256  }
  0x19   :  { %914 = vsyncadd [#allocation3], 4294967040 }
  0x1a   :  { %915 = dma.done.wait [#allocation6], 28672  }
  0x1b   :  { %916 = vsyncadd [#allocation6], 4294938624  ;;  %v925_v0 = vmov 0   ;;  %v56_v1 = vld [vmem:[%s1011_s0] sm:$0x3f]  ;;  %v176_v3 = vld [vmem:[#allocation5 + $0x360] sm:$0xff] }
  0x1c   :  { %808 = vset.pattern.permute.xlu0 %v925_v0  ;;  %v174_v2 = vld [vmem:[#allocation5 + $0x350] sm:$0xff]  ;;  %v173_v4 = vld [vmem:[#allocation5 + $0x348] sm:$0xff]  ;;  %v175_v5 = vld [vmem:[#allocation5 + $0x358] sm:$0xff]  ;;  %400 = vmatprep.subr.mxu1 %v176_v3  ;;  %vm927_vm0 = vmmov 0   ;;  %vm634_vm1 = vcmask 1045504   ;;  %vm630_vm2 = vcmask 48128  }
  0x1d   :  { %59 = vperm.xlu0 %808, %v56_v1   ;;  %329 = vmatprep.subr.mxu0 %v174_v2  ;;  %v167_v6 = vld [vmem:[#allocation5 + $0x318] sm:$0xff]  ;;  %v169_v7 = vld [vmem:[#allocation5 + $0x328] sm:$0xff]  ;;  %v166_v8 = vld [vmem:[#allocation5 + $0x310] sm:$0xff]  ;;  %s929_s20 = smov [#allocation8]   ;;  %s930_s22 = smov [#allocation7]  }
  0x1e   :  { %330 = vmatpush1.msra.mxu0 %v173_v4  ;;  %v168_v9 = vld [vmem:[#allocation5 + $0x320] sm:$0xff]  ;;  %401 = vmatpush1.msra.mxu1 %v175_v5  ;;  %v162_v11 = vld [vmem:[#allocation5 + $0x2f0] sm:$0xff]  ;;  %v159_v12 = vld [vmem:[#allocation5 + $0x2d8] sm:$0xff]  ;;  %s725_s21 = sshll.u32 %s929_s20, 4  ;;  %s715_s23 = sshll.u32 %s930_s22, 4  ;;  %s726_s21 = int_to_ptr.vmem [resolvable:$true] %s725_s21  ;;  %s716_s23 = int_to_ptr.vmem [resolvable:$true] %s715_s23 }
  0x1f   :  { %331 = vmatprep.subr.mxu0 %v167_v6  ;;  %v160_v10 = vld [vmem:[#allocation5 + $0x2e0] sm:$0xff]  ;;  %402 = vmatprep.subr.mxu1 %v169_v7  ;;  %v161_v13 = vld [vmem:[#allocation5 + $0x2e8] sm:$0xff]  ;;  %v155_v15 = vld [vmem:[#allocation5 + $0x2b8] sm:$0xff]  ;;  %s853_s24 = scalar_lea.vmem %s726_s21, 896  ;;  %p858_p11 = scmp.lt.s32.totalorder %s726_s21, %s726_s21 }
  0x20   :  { %332 = vmatpush1.msra.mxu0 %v166_v8  ;;  %v153_v14 = vld [vmem:[#allocation5 + $0x2a8] sm:$0xff]  ;;  %403 = vmatpush1.msra.mxu1 %v168_v9  ;;  %v152_v16 = vld [vmem:[#allocation5 + $0x2a0] sm:$0xff]  ;;  %v154_v17 = vld [vmem:[#allocation5 + $0x2b0] sm:$0xff]  ;;  %p854_p10 = scmp.ne.s32.totalorder %s726_s21, %s853_s24  ;;  %p859_p12 = scmp.lt.s32.totalorder %s853_s24, %s853_s24 }
  0x21   :  { %333 = vmatprep.subr.mxu0 %v160_v10  ;;  %404 = vmatprep.subr.mxu1 %v162_v11  ;;  %v146_v18 = vld [vmem:[#allocation5 + $0x270] sm:$0xff]  ;;  %v148_v19 = vld [vmem:[#allocation5 + $0x280] sm:$0xff]  ;;  %v145_v20 = vld [vmem:[#allocation5 + $0x268] sm:$0xff] }
  0x22   :  { %334 = vmatpush1.msra.mxu0 %v159_v12  ;;  %405 = vmatpush1.msra.mxu1 %v161_v13  ;;  %v147_v21 = vld [vmem:[#allocation5 + $0x278] sm:$0xff]  ;;  %v141_v23 = vld [vmem:[#allocation5 + $0x248] sm:$0xff]  ;;  %v138_v24 = vld [vmem:[#allocation5 + $0x230] sm:$0xff]  ;;  %p860_p13 = por %p859_p12, %p858_p11 }
  0x23   :  { %335 = vmatprep.subr.mxu0 %v153_v14  ;;  %406 = vmatprep.subr.mxu1 %v155_v15  ;;  %v139_v22 = vld [vmem:[#allocation5 + $0x238] sm:$0xff]  ;;  %v140_v25 = vld [vmem:[#allocation5 + $0x240] sm:$0xff]  ;;  %v134_v27 = vld [vmem:[#allocation5 + $0x210] sm:$0xff] }
  0x24   :  { %336 = vmatpush1.msra.mxu0 %v152_v16  ;;  %407 = vmatpush1.msra.mxu1 %v154_v17  ;;  %v132_v26 = vld [vmem:[#allocation5 + $0x200] sm:$0xff]  ;;  %v131_v28 = vld [vmem:[#allocation5 + $0x1f8] sm:$0xff]  ;;  %v133_v29 = vld [vmem:[#allocation5 + $0x208] sm:$0xff]  ;;  %p861_p0 = pnand %p860_p13, %p854_p10 }
  0x25   :  { %337 = vmatprep.subr.mxu0 %v146_v18  ;;  %408 = vmatprep.subr.mxu1 %v148_v19  ;;  %v125_v30 = vld [vmem:[#allocation5 + $0x1c8] sm:$0xff]  ;;  %v127_v31 = vld [vmem:[#allocation5 + $0x1d8] sm:$0xff]  ;;  %v124_v32 = vld [vmem:[#allocation5 + $0x1c0] sm:$0xff] }
  0x26   :  { %338 = vmatpush1.msra.mxu0 %v145_v20  ;;  %409 = vmatpush1.msra.mxu1 %v147_v21  ;;  %v126_v33 = vld [vmem:[#allocation5 + $0x1d0] sm:$0xff]  ;;  %v120_v35 = vld [vmem:[#allocation5 + $0x1a0] sm:$0xff]  ;;  %v117_v36 = vld [vmem:[#allocation5 + $0x188] sm:$0xff] }
  0x27   :  { %339 = vmatprep.subr.mxu0 %v139_v22  ;;  %410 = vmatprep.subr.mxu1 %v141_v23  ;;  %v118_v34 = vld [vmem:[#allocation5 + $0x190] sm:$0xff]  ;;  %v119_v37 = vld [vmem:[#allocation5 + $0x198] sm:$0xff]  ;;  %v113_v39 = vld [vmem:[#allocation5 + $0x168] sm:$0xff] }
  0x28   :  { %340 = vmatpush1.msra.mxu0 %v138_v24  ;;  %411 = vmatpush1.msra.mxu1 %v140_v25  ;;  %v111_v38 = vld [vmem:[#allocation5 + $0x158] sm:$0xff]  ;;  %v110_v40 = vld [vmem:[#allocation5 + $0x150] sm:$0xff]  ;;  %v112_v41 = vld [vmem:[#allocation5 + $0x160] sm:$0xff] }
  0x29   :  { %341 = vmatprep.subr.mxu0 %v132_v26  ;;  %412 = vmatprep.subr.mxu1 %v134_v27  ;;  %v104_v42 = vld [vmem:[#allocation5 + $0x120] sm:$0xff]  ;;  %v106_v43 = vld [vmem:[#allocation5 + $0x130] sm:$0xff]  ;;  %v103_v44 = vld [vmem:[#allocation5 + $0x118] sm:$0xff] }
  0x2a   :  { %342 = vmatpush1.msra.mxu0 %v131_v28  ;;  %413 = vmatpush1.msra.mxu1 %v133_v29  ;;  %v105_v45 = vld [vmem:[#allocation5 + $0x128] sm:$0xff]  ;;  %v99_v47 = vld [vmem:[#allocation5 + $0xf8] sm:$0xff]  ;;  %v96_v48 = vld [vmem:[#allocation5 + $0xe0] sm:$0xff] }
  0x2b   :  { %343 = vmatprep.subr.mxu0 %v125_v30  ;;  %414 = vmatprep.subr.mxu1 %v127_v31  ;;  %v97_v46 = vld [vmem:[#allocation5 + $0xe8] sm:$0xff]  ;;  %v98_v49 = vld [vmem:[#allocation5 + $0xf0] sm:$0xff]  ;;  %v92_v51 = vld [vmem:[#allocation5 + $0xc0] sm:$0xff] }
  0x2c   :  { %344 = vmatpush1.msra.mxu0 %v124_v32  ;;  %415 = vmatpush1.msra.mxu1 %v126_v33  ;;  %v90_v50 = vld [vmem:[#allocation5 + $0xb0] sm:$0xff]  ;;  %v89_v52 = vld [vmem:[#allocation5 + $0xa8] sm:$0xff]  ;;  %v91_v53 = vld [vmem:[#allocation5 + $0xb8] sm:$0xff] }
  0x2d   :  { %345 = vmatprep.subr.mxu0 %v118_v34  ;;  %416 = vmatprep.subr.mxu1 %v120_v35  ;;  %v83_v54 = vld [vmem:[#allocation5 + $0x78] sm:$0xff]  ;;  %v85_v55 = vld [vmem:[#allocation5 + $0x88] sm:$0xff]  ;;  %v82_v56 = vld [vmem:[#allocation5 + $0x70] sm:$0xff] }
  0x2e   :  { %346 = vmatpush1.msra.mxu0 %v117_v36  ;;  %417 = vmatpush1.msra.mxu1 %v119_v37  ;;  %v84_v57 = vld [vmem:[#allocation5 + $0x80] sm:$0xff]  ;;  %v78_v59 = vld [vmem:[#allocation5 + $0x50] sm:$0xff]  ;;  %v75_v60 = vld [vmem:[#allocation5 + $0x38] sm:$0xff] }
  0x2f   :  { %347 = vmatprep.subr.mxu0 %v111_v38  ;;  %418 = vmatprep.subr.mxu1 %v113_v39  ;;  %v76_v58 = vld [vmem:[#allocation5 + $0x40] sm:$0xff]  ;;  %v77_v61 = vld [vmem:[#allocation5 + $0x48] sm:$0xff]  ;;  %v71_v63 = vld [vmem:[#allocation5 + $0x18] sm:$0xff] }
  0x30   :  { %348 = vmatpush1.msra.mxu0 %v110_v40  ;;  %419 = vmatpush1.msra.mxu1 %v112_v41  ;;  %v69_v62 = vld [vmem:[#allocation5 + $0x8] sm:$0xff]  ;;  %v68_v0 = vld [vmem:[#allocation5] sm:$0xff]  ;;  %v70_v1 = vld [vmem:[#allocation5 + $0x10] sm:$0xff] }
  0x31   :  { %349 = vmatprep.subr.mxu0 %v104_v42  ;;  %420 = vmatprep.subr.mxu1 %v106_v43  ;;  %v286_v2 = vld [vmem:[#allocation5 + $0x6d0] sm:$0xff]  ;;  %v288_v3 = vld [vmem:[#allocation5 + $0x6e0] sm:$0xff]  ;;  %v285_v4 = vld [vmem:[#allocation5 + $0x6c8] sm:$0xff] }
  0x32   :  { %350 = vmatpush1.msra.mxu0 %v103_v44  ;;  %421 = vmatpush1.msra.mxu1 %v105_v45  ;;  %v287_v5 = vld [vmem:[#allocation5 + $0x6d8] sm:$0xff]  ;;  %v281_v7 = vld [vmem:[#allocation5 + $0x6a8] sm:$0xff]  ;;  %v278_v8 = vld [vmem:[#allocation5 + $0x690] sm:$0xff] }
  0x33   :  { %351 = vmatprep.subr.mxu0 %v97_v46  ;;  %422 = vmatprep.subr.mxu1 %v99_v47  ;;  %v279_v6 = vld [vmem:[#allocation5 + $0x698] sm:$0xff]  ;;  %v280_v9 = vld [vmem:[#allocation5 + $0x6a0] sm:$0xff]  ;;  %v274_v11 = vld [vmem:[#allocation5 + $0x670] sm:$0xff] }
  0x34   :  { %352 = vmatpush1.msra.mxu0 %v96_v48  ;;  %423 = vmatpush1.msra.mxu1 %v98_v49  ;;  %v272_v10 = vld [vmem:[#allocation5 + $0x660] sm:$0xff]  ;;  %v271_v12 = vld [vmem:[#allocation5 + $0x658] sm:$0xff]  ;;  %v273_v13 = vld [vmem:[#allocation5 + $0x668] sm:$0xff] }
  0x35   :  { %353 = vmatprep.subr.mxu0 %v90_v50  ;;  %424 = vmatprep.subr.mxu1 %v92_v51  ;;  %v265_v14 = vld [vmem:[#allocation5 + $0x628] sm:$0xff]  ;;  %v267_v15 = vld [vmem:[#allocation5 + $0x638] sm:$0xff]  ;;  %v264_v16 = vld [vmem:[#allocation5 + $0x620] sm:$0xff] }
  0x36   :  { %354 = vmatpush1.msra.mxu0 %v89_v52  ;;  %425 = vmatpush1.msra.mxu1 %v91_v53  ;;  %v266_v17 = vld [vmem:[#allocation5 + $0x630] sm:$0xff]  ;;  %v260_v19 = vld [vmem:[#allocation5 + $0x600] sm:$0xff]  ;;  %v257_v20 = vld [vmem:[#allocation5 + $0x5e8] sm:$0xff] }
  0x37   :  { %355 = vmatprep.subr.mxu0 %v83_v54  ;;  %426 = vmatprep.subr.mxu1 %v85_v55  ;;  %v258_v18 = vld [vmem:[#allocation5 + $0x5f0] sm:$0xff]  ;;  %v259_v21 = vld [vmem:[#allocation5 + $0x5f8] sm:$0xff]  ;;  %v253_v23 = vld [vmem:[#allocation5 + $0x5c8] sm:$0xff] }
  0x38   :  { %356 = vmatpush1.msra.mxu0 %v82_v56  ;;  %427 = vmatpush1.msra.mxu1 %v84_v57  ;;  %v251_v22 = vld [vmem:[#allocation5 + $0x5b8] sm:$0xff]  ;;  %v250_v24 = vld [vmem:[#allocation5 + $0x5b0] sm:$0xff]  ;;  %v252_v25 = vld [vmem:[#allocation5 + $0x5c0] sm:$0xff] }
  0x39   :  { %357 = vmatprep.subr.mxu0 %v76_v58  ;;  %428 = vmatprep.subr.mxu1 %v78_v59  ;;  %v244_v26 = vld [vmem:[#allocation5 + $0x580] sm:$0xff]  ;;  %v246_v27 = vld [vmem:[#allocation5 + $0x590] sm:$0xff]  ;;  %v243_v28 = vld [vmem:[#allocation5 + $0x578] sm:$0xff] }
  0x3a   :  { %358 = vmatpush1.msra.mxu0 %v75_v60  ;;  %429 = vmatpush1.msra.mxu1 %v77_v61  ;;  %v245_v29 = vld [vmem:[#allocation5 + $0x588] sm:$0xff]  ;;  %v239_v31 = vld [vmem:[#allocation5 + $0x558] sm:$0xff]  ;;  %v236_v32 = vld [vmem:[#allocation5 + $0x540] sm:$0xff] }
  0x3b   :  { %359 = vmatprep.subr.mxu0 %v69_v62  ;;  %430 = vmatprep.subr.mxu1 %v71_v63  ;;  %v237_v30 = vld [vmem:[#allocation5 + $0x548] sm:$0xff]  ;;  %v238_v33 = vld [vmem:[#allocation5 + $0x550] sm:$0xff]  ;;  %v232_v35 = vld [vmem:[#allocation5 + $0x520] sm:$0xff] }
  0x3c   :  { %360 = vmatpush1.msra.mxu0 %v68_v0  ;;  %431 = vmatpush1.msra.mxu1 %v70_v1  ;;  %v230_v34 = vld [vmem:[#allocation5 + $0x510] sm:$0xff]  ;;  %v229_v36 = vld [vmem:[#allocation5 + $0x508] sm:$0xff]  ;;  %v231_v37 = vld [vmem:[#allocation5 + $0x518] sm:$0xff] }
  0x3d   :  { %361 = vmatprep.subr.mxu0 %v286_v2  ;;  %432 = vmatprep.subr.mxu1 %v288_v3  ;;  %v223_v38 = vld [vmem:[#allocation5 + $0x4d8] sm:$0xff]  ;;  %v225_v39 = vld [vmem:[#allocation5 + $0x4e8] sm:$0xff]  ;;  %v222_v40 = vld [vmem:[#allocation5 + $0x4d0] sm:$0xff] }
  0x3e   :  { %362 = vmatpush2.msra.mxu0 %v285_v4  ;;  %433 = vmatpush2.msra.mxu1 %v287_v5  ;;  %v224_v41 = vld [vmem:[#allocation5 + $0x4e0] sm:$0xff]  ;;  %v218_v43 = vld [vmem:[#allocation5 + $0x4b0] sm:$0xff]  ;;  %v215_v44 = vld [vmem:[#allocation5 + $0x498] sm:$0xff] }
  0x3f   :  { %363 = vmatprep.subr.mxu0 %v279_v6  ;;  %434 = vmatprep.subr.mxu1 %v281_v7  ;;  %v216_v42 = vld [vmem:[#allocation5 + $0x4a0] sm:$0xff]  ;;  %v217_v45 = vld [vmem:[#allocation5 + $0x4a8] sm:$0xff]  ;;  %v211_v47 = vld [vmem:[#allocation5 + $0x478] sm:$0xff] }
  0x40   :  { %364 = vmatpush2.msra.mxu0 %v278_v8  ;;  %435 = vmatpush2.msra.mxu1 %v280_v9  ;;  %v209_v46 = vld [vmem:[#allocation5 + $0x468] sm:$0xff]  ;;  %v208_v48 = vld [vmem:[#allocation5 + $0x460] sm:$0xff]  ;;  %v210_v49 = vld [vmem:[#allocation5 + $0x470] sm:$0xff] }
  0x41   :  { %365 = vmatprep.subr.mxu0 %v272_v10  ;;  %436 = vmatprep.subr.mxu1 %v274_v11  ;;  %v202_v50 = vld [vmem:[#allocation5 + $0x430] sm:$0xff]  ;;  %v204_v51 = vld [vmem:[#allocation5 + $0x440] sm:$0xff]  ;;  %v201_v52 = vld [vmem:[#allocation5 + $0x428] sm:$0xff] }
  0x42   :  { %366 = vmatpush2.msra.mxu0 %v271_v12  ;;  %437 = vmatpush2.msra.mxu1 %v273_v13  ;;  %v203_v53 = vld [vmem:[#allocation5 + $0x438] sm:$0xff]  ;;  %v197_v55 = vld [vmem:[#allocation5 + $0x408] sm:$0xff]  ;;  %v194_v56 = vld [vmem:[#allocation5 + $0x3f0] sm:$0xff] }
  0x43   :  { %367 = vmatprep.subr.mxu0 %v265_v14  ;;  %438 = vmatprep.subr.mxu1 %v267_v15  ;;  %v195_v54 = vld [vmem:[#allocation5 + $0x3f8] sm:$0xff]  ;;  %v196_v57 = vld [vmem:[#allocation5 + $0x400] sm:$0xff]  ;;  %v190_v59 = vld [vmem:[#allocation5 + $0x3d0] sm:$0xff] }
  0x44   :  { %368 = vmatpush2.msra.mxu0 %v264_v16  ;;  %439 = vmatpush2.msra.mxu1 %v266_v17  ;;  %v188_v58 = vld [vmem:[#allocation5 + $0x3c0] sm:$0xff]  ;;  %v187_v60 = vld [vmem:[#allocation5 + $0x3b8] sm:$0xff]  ;;  %v189_v61 = vld [vmem:[#allocation5 + $0x3c8] sm:$0xff] }
  0x45   :  { %369 = vmatprep.subr.mxu0 %v258_v18  ;;  %440 = vmatprep.subr.mxu1 %v260_v19  ;;  %v181_v62 = vld [vmem:[#allocation5 + $0x388] sm:$0xff]  ;;  %v183_v63 = vld [vmem:[#allocation5 + $0x398] sm:$0xff]  ;;  %v180_v0 = vld [vmem:[#allocation5 + $0x380] sm:$0xff] }
  0x46   :  { %370 = vmatpush2.msra.mxu0 %v257_v20  ;;  %441 = vmatpush2.msra.mxu1 %v259_v21  ;;  %v182_v1 = vld [vmem:[#allocation5 + $0x390] sm:$0xff]  ;;  %v291_v3 = vld [vmem:[#allocation5 + $0x6f8] sm:$0xff]  ;;  %v177_v11 = vld [vmem:[#allocation5 + $0x368] sm:$0xff] }
  0x47   :  { %371 = vmatprep.subr.mxu0 %v251_v22  ;;  %442 = vmatprep.subr.mxu1 %v253_v23  ;;  %v178_v2 = vld [vmem:[#allocation5 + $0x370] sm:$0xff]  ;;  %v55_v5 = vld [vmem:[#allocation2 + $0x8] sm:$0x3f]  ;;  %v284_v14 = vld [vmem:[#allocation5 + $0x6c0] sm:$0xff] }
  0x48   :  { %372 = vmatpush2.msra.mxu0 %v250_v24  ;;  %443 = vmatpush2.msra.mxu1 %v252_v25  ;;  %v54_v4 = vld [vmem:[#allocation2] sm:$0x3f]  ;;  %v179_v12 = vld [vmem:[#allocation5 + $0x378] sm:$0xff]  ;;  %v172_v16 = vld [vmem:[#allocation5 + $0x340] sm:$0xff] }
  0x49   :  { %373 = vmatprep.subr.mxu0 %v244_v26  ;;  %444 = vmatprep.subr.mxu1 %v246_v27  ;;  %v171_v13 = vld [vmem:[#allocation5 + $0x338] sm:$0xff]  ;;  %v170_v15 = vld [vmem:[#allocation5 + $0x330] sm:$0xff]  ;;  %v164_v17 = vld [vmem:[#allocation5 + $0x300] sm:$0xff] }
  0x4a   :  { %374 = vmatpush2.msra.mxu0 %v243_v28  ;;  %445 = vmatpush2.msra.mxu1 %v245_v29  ;;  %v277_v18 = vld [vmem:[#allocation5 + $0x688] sm:$0xff]  ;;  %v163_v19 = vld [vmem:[#allocation5 + $0x2f8] sm:$0xff]  ;;  %v270_v22 = vld [vmem:[#allocation5 + $0x650] sm:$0xff] }
  0x4b   :  { %375 = vmatprep.subr.mxu0 %v237_v30  ;;  %446 = vmatprep.subr.mxu1 %v239_v31  ;;  %v165_v20 = vld [vmem:[#allocation5 + $0x308] sm:$0xff]  ;;  %v156_v23 = vld [vmem:[#allocation5 + $0x2c0] sm:$0xff]  ;;  %v158_v24 = vld [vmem:[#allocation5 + $0x2d0] sm:$0xff] }
  0x4c   :  { %376 = vmatpush2.msra.mxu0 %v236_v32  ;;  %447 = vmatpush2.msra.mxu1 %v238_v33  ;;  %v157_v21 = vld [vmem:[#allocation5 + $0x2c8] sm:$0xff]  ;;  %v150_v25 = vld [vmem:[#allocation5 + $0x290] sm:$0xff]  ;;  %v263_v26 = vld [vmem:[#allocation5 + $0x618] sm:$0xff] }
  0x4d   :  { %377 = vmatprep.subr.mxu0 %v230_v34  ;;  %448 = vmatprep.subr.mxu1 %v232_v35  ;;  %v149_v27 = vld [vmem:[#allocation5 + $0x288] sm:$0xff]  ;;  %v151_v28 = vld [vmem:[#allocation5 + $0x298] sm:$0xff]  ;;  %v256_v30 = vld [vmem:[#allocation5 + $0x5e0] sm:$0xff] }
  0x4e   :  { %378 = vmatpush2.msra.mxu0 %v229_v36  ;;  %449 = vmatpush2.msra.mxu1 %v231_v37  ;;  %v143_v29 = vld [vmem:[#allocation5 + $0x258] sm:$0xff]  ;;  %v142_v31 = vld [vmem:[#allocation5 + $0x250] sm:$0xff]  ;;  %v144_v32 = vld [vmem:[#allocation5 + $0x260] sm:$0xff] }
  0x4f   :  { %379 = vmatprep.subr.mxu0 %v223_v38  ;;  %450 = vmatprep.subr.mxu1 %v225_v39  ;;  %v136_v33 = vld [vmem:[#allocation5 + $0x220] sm:$0xff]  ;;  %v249_v34 = vld [vmem:[#allocation5 + $0x5a8] sm:$0xff]  ;;  %v135_v35 = vld [vmem:[#allocation5 + $0x218] sm:$0xff] }
  0x50   :  { %380 = vmatpush2.msra.mxu0 %v222_v40  ;;  %451 = vmatpush2.msra.mxu1 %v224_v41  ;;  %v137_v36 = vld [vmem:[#allocation5 + $0x228] sm:$0xff]  ;;  %v242_v38 = vld [vmem:[#allocation5 + $0x570] sm:$0xff]  ;;  %v128_v39 = vld [vmem:[#allocation5 + $0x1e0] sm:$0xff] }
  0x51   :  { %381 = vmatprep.subr.mxu0 %v216_v42  ;;  %452 = vmatprep.subr.mxu1 %v218_v43  ;;  %v129_v37 = vld [vmem:[#allocation5 + $0x1e8] sm:$0xff]  ;;  %v130_v40 = vld [vmem:[#allocation5 + $0x1f0] sm:$0xff]  ;;  %v235_v42 = vld [vmem:[#allocation5 + $0x538] sm:$0xff] }
  0x52   :  { %382 = vmatpush2.msra.mxu0 %v215_v44  ;;  %453 = vmatpush2.msra.mxu1 %v217_v45  ;;  %v122_v41 = vld [vmem:[#allocation5 + $0x1b0] sm:$0xff]  ;;  %v121_v43 = vld [vmem:[#allocation5 + $0x1a8] sm:$0xff]  ;;  %v123_v44 = vld [vmem:[#allocation5 + $0x1b8] sm:$0xff] }
  0x53   :  { %383 = vmatprep.subr.mxu0 %v209_v46  ;;  %454 = vmatprep.subr.mxu1 %v211_v47  ;;  %v115_v45 = vld [vmem:[#allocation5 + $0x178] sm:$0xff]  ;;  %v228_v46 = vld [vmem:[#allocation5 + $0x500] sm:$0xff]  ;;  %v114_v47 = vld [vmem:[#allocation5 + $0x170] sm:$0xff] }
  0x54   :  { %384 = vmatpush2.msra.mxu0 %v208_v48  ;;  %455 = vmatpush2.msra.mxu1 %v210_v49  ;;  %v116_v48 = vld [vmem:[#allocation5 + $0x180] sm:$0xff] }
  0x55   :  { %385 = vmatprep.subr.mxu0 %v202_v50  ;;  %456 = vmatprep.subr.mxu1 %v204_v51  ;;  %v108_v49 = vld [vmem:[#allocation5 + $0x140] sm:$0xff]  ;;  %v221_v50 = vld [vmem:[#allocation5 + $0x4c8] sm:$0xff]  ;;  %v107_v51 = vld [vmem:[#allocation5 + $0x138] sm:$0xff] }
  0x56   :  { %386 = vmatpush2.msra.mxu0 %v201_v52  ;;  %457 = vmatpush2.msra.mxu1 %v203_v53  ;;  %v109_v52 = vld [vmem:[#allocation5 + $0x148] sm:$0xff] }
  0x57   :  { %387 = vmatprep.subr.mxu0 %v195_v54  ;;  %458 = vmatprep.subr.mxu1 %v197_v55  ;;  %v101_v53 = vld [vmem:[#allocation5 + $0x108] sm:$0xff]  ;;  %v214_v54 = vld [vmem:[#allocation5 + $0x490] sm:$0xff]  ;;  %v100_v55 = vld [vmem:[#allocation5 + $0x100] sm:$0xff] }
  0x58   :  { %388 = vmatpush2.msra.mxu0 %v194_v56  ;;  %459 = vmatpush2.msra.mxu1 %v196_v57  ;;  %v102_v56 = vld [vmem:[#allocation5 + $0x110] sm:$0xff] }
  0x59   :  { %389 = vmatprep.subr.mxu0 %v188_v58  ;;  %460 = vmatprep.subr.mxu1 %v190_v59  ;;  %v94_v57 = vld [vmem:[#allocation5 + $0xd0] sm:$0xff]  ;;  %v207_v58 = vld [vmem:[#allocation5 + $0x458] sm:$0xff]  ;;  %v93_v59 = vld [vmem:[#allocation5 + $0xc8] sm:$0xff] }
  0x5a   :  { %390 = vmatpush2.msra.mxu0 %v187_v60  ;;  %461 = vmatpush2.msra.mxu1 %v189_v61  ;;  %v95_v60 = vld [vmem:[#allocation5 + $0xd8] sm:$0xff] }
  0x5b   :  { %391 = vmatprep.subr.mxu0 %v181_v62  ;;  %462 = vmatprep.subr.mxu1 %v183_v63  ;;  %v87_v61 = vld [vmem:[#allocation5 + $0x98] sm:$0xff]  ;;  %v200_v62 = vld [vmem:[#allocation5 + $0x420] sm:$0xff]  ;;  %v86_v63 = vld [vmem:[#allocation5 + $0x90] sm:$0xff] }
  0x5c   :  { %392 = vmatpush2.msra.mxu0 %v180_v0  ;;  %463 = vmatpush2.msra.mxu1 %v182_v1  ;;  %v88_v0 = vld [vmem:[#allocation5 + $0xa0] sm:$0xff] }
  0x5d   :  { %471 = vmatprep.subr.mxu0 %v178_v2  ;;  %755 = vmatprep.subr.mxu1 %v291_v3  ;;  %v80_v1 = vld [vmem:[#allocation5 + $0x60] sm:$0xff]  ;;  %v193_v2 = vld [vmem:[#allocation5 + $0x3e8] sm:$0xff]  ;;  %v79_v3 = vld [vmem:[#allocation5 + $0x58] sm:$0xff] }
  0x98   :  { %v60_v6 = vpop.permute.xlu0 %59 }
  0x99   :  { %v62_v7 = vadd.f32 %v60_v6, %v54_v4  ;;  %v63_v8 = vadd.f32 %v60_v6, %v55_v5  ;;  %v81_v4 = vld [vmem:[#allocation5 + $0x68] sm:$0xff]  ;;  %v186_v6 = vld [vmem:[#allocation5 + $0x3b0] sm:$0xff] }
  0x9a   :  { %v73_v5 = vld [vmem:[#allocation5 + $0x28] sm:$0xff] }
  0x9b   :  { %809 = vtanh.f32 %v62_v7  ;;  %v72_v7 = vld [vmem:[#allocation5 + $0x20] sm:$0xff] }
  0x9c   :  { %811 = vtanh.f32 %v63_v8  ;;  %v74_v8 = vld [vmem:[#allocation5 + $0x30] sm:$0xff] }
  0xa8   :  { %v986_v9 = vpop.eup %809 }
  0xa9   :  { %v812_v10 = vpop.eup %811  ;;  %66 = vst [vmem:[#allocation7] sm:$0x3f] %v986_v9 }
  0xaa   :  { %67 = vst [vmem:[#allocation7 + $0x8] sm:$0x3f] %v812_v10  ;;  %393 = vmatprep.mubr.f32.mxu0 %v812_v10  ;;  %464 = vmatprep.mubr.f32.mxu1 %v812_v10 }
  0xab   :  { %394 = vmatmul.mubr.f32.vlgmr.msra.gmra.mxu0 %v986_v9  ;;  %465 = vmatmul.mubr.f32.vlgmr.msra.gmra.mxu1 %v986_v9 }
  0xac   :  { %472 = vmatpush1.msra.mxu0 %v177_v11  ;;  %756 = vmatpush3.msra.mxu1 %v179_v12  ;;  %v289_v11 = vld [vmem:[#allocation5 + $0x6e8] sm:$0xff]  ;;  %v283_v12 = vld [vmem:[#allocation5 + $0x6b8] sm:$0xff] }
  0xad   :  { %473 = vmatprep.subr.mxu0 %v171_v13  ;;  %535 = vmatprep.mubr.f32.mxu0 %v812_v10  ;;  %v282_v13 = vld [vmem:[#allocation5 + $0x6b0] sm:$0xff] }
  0xae   :  { %757 = vmatprep.subr.mxu1 %v284_v14  ;;  %606 = vmatprep.mubr.f32.mxu1 %v812_v10  ;;  %v290_v10 = vld [vmem:[#allocation5 + $0x6f0] sm:$0xff]  ;;  %v276_v14 = vld [vmem:[#allocation5 + $0x680] sm:$0xff] }
  0xaf   :  { %474 = vmatpush1.msra.mxu0 %v170_v15  ;;  %758 = vmatpush3.msra.mxu1 %v172_v16  ;;  %v275_v15 = vld [vmem:[#allocation5 + $0x678] sm:$0xff]  ;;  %v269_v16 = vld [vmem:[#allocation5 + $0x648] sm:$0xff] }
  0xb0   :  { %475 = vmatprep.subr.mxu0 %v164_v17  ;;  %759 = vmatprep.subr.mxu1 %v277_v18  ;;  %v268_v17 = vld [vmem:[#allocation5 + $0x640] sm:$0xff]  ;;  %v262_v18 = vld [vmem:[#allocation5 + $0x610] sm:$0xff] }
  0xb1   :  { %476 = vmatpush1.msra.mxu0 %v163_v19  ;;  %760 = vmatpush3.msra.mxu1 %v165_v20  ;;  %v261_v19 = vld [vmem:[#allocation5 + $0x608] sm:$0xff]  ;;  %v255_v20 = vld [vmem:[#allocation5 + $0x5d8] sm:$0xff] }
  0xb2   :  { %477 = vmatprep.subr.mxu0 %v157_v21  ;;  %761 = vmatprep.subr.mxu1 %v270_v22  ;;  %v254_v21 = vld [vmem:[#allocation5 + $0x5d0] sm:$0xff]  ;;  %v248_v22 = vld [vmem:[#allocation5 + $0x5a0] sm:$0xff] }
  0xb3   :  { %478 = vmatpush1.msra.mxu0 %v156_v23  ;;  %762 = vmatpush3.msra.mxu1 %v158_v24  ;;  %v247_v23 = vld [vmem:[#allocation5 + $0x598] sm:$0xff]  ;;  %v241_v24 = vld [vmem:[#allocation5 + $0x568] sm:$0xff] }
  0xb4   :  { %479 = vmatprep.subr.mxu0 %v150_v25  ;;  %763 = vmatprep.subr.mxu1 %v263_v26  ;;  %v240_v25 = vld [vmem:[#allocation5 + $0x560] sm:$0xff]  ;;  %v234_v26 = vld [vmem:[#allocation5 + $0x530] sm:$0xff] }
  0xb5   :  { %480 = vmatpush1.msra.mxu0 %v149_v27  ;;  %764 = vmatpush3.msra.mxu1 %v151_v28  ;;  %v233_v27 = vld [vmem:[#allocation5 + $0x528] sm:$0xff]  ;;  %v227_v28 = vld [vmem:[#allocation5 + $0x4f8] sm:$0xff] }
  0xb6   :  { %481 = vmatprep.subr.mxu0 %v143_v29  ;;  %765 = vmatprep.subr.mxu1 %v256_v30  ;;  %v226_v29 = vld [vmem:[#allocation5 + $0x4f0] sm:$0xff]  ;;  %v220_v30 = vld [vmem:[#allocation5 + $0x4c0] sm:$0xff] }
  0xb7   :  { %482 = vmatpush1.msra.mxu0 %v142_v31  ;;  %766 = vmatpush3.msra.mxu1 %v144_v32  ;;  %v219_v31 = vld [vmem:[#allocation5 + $0x4b8] sm:$0xff]  ;;  %v213_v32 = vld [vmem:[#allocation5 + $0x488] sm:$0xff] }
  0xb8   :  { %483 = vmatprep.subr.mxu0 %v136_v33  ;;  %767 = vmatprep.subr.mxu1 %v249_v34  ;;  %v212_v33 = vld [vmem:[#allocation5 + $0x480] sm:$0xff]  ;;  %v206_v34 = vld [vmem:[#allocation5 + $0x450] sm:$0xff] }
  0xb9   :  { %484 = vmatpush1.msra.mxu0 %v135_v35  ;;  %768 = vmatpush3.msra.mxu1 %v137_v36  ;;  %v205_v35 = vld [vmem:[#allocation5 + $0x448] sm:$0xff]  ;;  %v199_v36 = vld [vmem:[#allocation5 + $0x418] sm:$0xff] }
  0xba   :  { %485 = vmatprep.subr.mxu0 %v129_v37  ;;  %769 = vmatprep.subr.mxu1 %v242_v38  ;;  %v198_v37 = vld [vmem:[#allocation5 + $0x410] sm:$0xff]  ;;  %v192_v38 = vld [vmem:[#allocation5 + $0x3e0] sm:$0xff] }
  0xbb   :  { %486 = vmatpush1.msra.mxu0 %v128_v39  ;;  %770 = vmatpush3.msra.mxu1 %v130_v40  ;;  %v191_v39 = vld [vmem:[#allocation5 + $0x3d8] sm:$0xff]  ;;  %v185_v40 = vld [vmem:[#allocation5 + $0x3a8] sm:$0xff] }
  0xbc   :  { %487 = vmatprep.subr.mxu0 %v122_v41  ;;  %771 = vmatprep.subr.mxu1 %v235_v42  ;;  %v184_v41 = vld [vmem:[#allocation5 + $0x3a0] sm:$0xff]  ;;  %v926_v42 = vmov 0.0  }
  0xbd   :  { %488 = vmatpush1.msra.mxu0 %v121_v43  ;;  %772 = vmatpush3.msra.mxu1 %v123_v44  ;;  %v294_v43 = vlaneseq }
  0xbe   :  { %489 = vmatprep.subr.mxu0 %v115_v45  ;;  %773 = vmatprep.subr.mxu1 %v228_v46 }
  0xbf   :  { %490 = vmatpush1.msra.mxu0 %v114_v47  ;;  %774 = vmatpush3.msra.mxu1 %v116_v48  ;;  %v295_v44 = vshrl.u32 %v294_v43, 7  ;;  %v292_v47 = vld [vmem:[%s1014_s3] sm:$0xff]  ;;  %s928_s3 = smov 118  }
  0xc0   :  { %491 = vmatprep.subr.mxu0 %v108_v49  ;;  %775 = vmatprep.subr.mxu1 %v221_v50 }
  0xc1   :  { %492 = vmatpush1.msra.mxu0 %v107_v51  ;;  %776 = vmatpush3.msra.mxu1 %v109_v52  ;;  %v296_v45 = vsub.s32 0, %v295_v44  ;;  %v304_v46 = vsub.s32 2, %v295_v44  ;;  %v300_v48 = vsub.s32 1, %v295_v44  ;;  %v308_v49 = vsub.s32 3, %v295_v44 }
  0xc2   :  { %493 = vmatprep.subr.mxu0 %v101_v53  ;;  %777 = vmatprep.subr.mxu1 %v214_v54 }
  0xc3   :  { %494 = vmatpush1.msra.mxu0 %v100_v55  ;;  %778 = vmatpush3.msra.mxu1 %v102_v56  ;;  %v297_v50 = vrot.slane %v292_v47, %v296_v45  ;;  %v305_v51 = vrot.slane %v292_v47, %v304_v46  ;;  %v301_v52 = vrot.slane %v292_v47, %v300_v48 }
  0xc4   :  { %495 = vmatprep.subr.mxu0 %v94_v57  ;;  %779 = vmatprep.subr.mxu1 %v207_v58  ;;  %v309_v53 = vrot.slane %v292_v47, %v308_v49 }
  0xc5   :  { %496 = vmatpush1.msra.mxu0 %v93_v59  ;;  %780 = vmatpush3.msra.mxu1 %v95_v60 }
  0xc6   :  { %497 = vmatprep.subr.mxu0 %v87_v61  ;;  %781 = vmatprep.subr.mxu1 %v200_v62  ;;  %v320_v61 = vsub.s32 6, %v295_v44 }
  0xc7   :  { %498 = vmatpush1.msra.mxu0 %v86_v63  ;;  %782 = vmatpush3.msra.mxu1 %v88_v0 }
  0xc8   :  { %499 = vmatprep.subr.mxu0 %v80_v1  ;;  %783 = vmatprep.subr.mxu1 %v193_v2  ;;  %v321_v63 = vrot.slane %v292_v47, %v320_v61 }
  0xc9   :  { %500 = vmatpush1.msra.mxu0 %v79_v3  ;;  %784 = vmatpush3.msra.mxu1 %v81_v4  ;;  %v312_v3 = vsub.s32 4, %v295_v44  ;;  %v316_v4 = vsub.s32 5, %v295_v44 }
  0xca   :  { %501 = vmatprep.subr.mxu0 %v73_v5  ;;  %785 = vmatprep.subr.mxu1 %v186_v6 }
  0xcb   :  { %502 = vmatpush1.msra.mxu0 %v72_v7  ;;  %786 = vmatpush3.msra.mxu1 %v74_v8  ;;  %v313_v5 = vrot.slane %v292_v47, %v312_v3  ;;  %v317_v6 = vrot.slane %v292_v47, %v316_v4 }
  0xcc   :  { %503 = vmatprep.subr.mxu0 %v290_v10  ;;  %607 = vmatmul.mubr.f32.vlgmr.msra.gmra.mxu1 %v986_v9 }
  0xcd   :  { %504 = vmatpush2.msra.mxu0 %v289_v11  ;;  %792 = vmatprep.subr.mxu1 %v926_v42 }
  0xce   :  { %505 = vmatprep.subr.mxu0 %v283_v12  ;;  %794 = vmatprep.mubr.msk.f32.mxu1 %vm927_vm0, %v926_v42  ;;  %v619_v12 = vld [vmem:[%s1015_s4] sm:$0x3] }
  0xcf   :  { %506 = vmatpush2.msra.mxu0 %v282_v13 }
  0xd0   :  { %507 = vmatprep.subr.mxu0 %v276_v14 }
  0xd1   :  { %508 = vmatpush2.msra.mxu0 %v275_v15 }
  0xd2   :  { %509 = vmatprep.subr.mxu0 %v269_v16 }
  0xd3   :  { %510 = vmatpush2.msra.mxu0 %v268_v17 }
  0xd4   :  { %511 = vmatprep.subr.mxu0 %v262_v18 }
  0xd5   :  { %512 = vmatpush2.msra.mxu0 %v261_v19 }
  0xd6   :  { %513 = vmatprep.subr.mxu0 %v255_v20 }
  0xd7   :  { %514 = vmatpush2.msra.mxu0 %v254_v21 }
  0xd8   :  { %515 = vmatprep.subr.mxu0 %v248_v22 }
  0xd9   :  { %516 = vmatpush2.msra.mxu0 %v247_v23 }
  0xda   :  { %517 = vmatprep.subr.mxu0 %v241_v24 }
  0xdb   :  { %518 = vmatpush2.msra.mxu0 %v240_v25 }
  0xdc   :  { %519 = vmatprep.subr.mxu0 %v234_v26 }
  0xdd   :  { %520 = vmatpush2.msra.mxu0 %v233_v27 }
  0xde   :  { %521 = vmatprep.subr.mxu0 %v227_v28 }
  0xdf   :  { %522 = vmatpush2.msra.mxu0 %v226_v29 }
  0xe0   :  { %523 = vmatprep.subr.mxu0 %v220_v30 }
  0xe1   :  { %524 = vmatpush2.msra.mxu0 %v219_v31 }
  0xe2   :  { %525 = vmatprep.subr.mxu0 %v213_v32 }
  0xe3   :  { %526 = vmatpush2.msra.mxu0 %v212_v33 }
  0xe4   :  { %527 = vmatprep.subr.mxu0 %v206_v34 }
  0xe5   :  { %528 = vmatpush2.msra.mxu0 %v205_v35 }
  0xe6   :  { %529 = vmatprep.subr.mxu0 %v199_v36 }
  0xe7   :  { %530 = vmatpush2.msra.mxu0 %v198_v37 }
  0xe8   :  { %531 = vmatprep.subr.mxu0 %v192_v38 }
  0xe9   :  { %532 = vmatpush2.msra.mxu0 %v191_v39 }
  0xea   :  { %533 = vmatprep.subr.mxu0 %v185_v40 }
  0xeb   :  { %534 = vmatpush2.msra.mxu0 %v184_v41 }
  0xec   :  { %536 = vmatmul.mubr.f32.vlgmr.msra.gmra.mxu0 %v986_v9 }
 0x16b   :  { %v395_v54 = vpop.f32.mrf.mxu0  ;;  %v466_v55 = vpop.f32.mrf.mxu1 }
 0x16c   :  { %v396_v56 = vadd.f32 %v395_v54, %v297_v50  ;;  %v467_v9 = vadd.f32 %v466_v55, %v305_v51 }
 0x16d   :  { %v397_v57 = vpop.f32.mrf.mxu0  ;;  %v468_v58 = vpop.f32.mrf.mxu1 }
 0x16e   :  { %612 = vst [vmem:[#allocation8] sm:$0x3f] %v396_v56  ;;  %614 = vst [vmem:[#allocation8 + $0x10] sm:$0x3f] %v467_v9  ;;  %v398_v59 = vadd.f32 %v397_v57, %v301_v52  ;;  %v469_v60 = vadd.f32 %v468_v58, %v309_v53 }
 0x170   :  { %613 = vst [vmem:[#allocation8 + $0x8] sm:$0x3f] %v398_v59  ;;  %615 = vst [vmem:[#allocation8 + $0x18] sm:$0x3f] %v469_v60 }
 0x18c   :  { %v787_v62 = vpop.f32.mrf.mxu1 }
 0x18e   :  { %v788_v0 = vpop.f32.mrf.mxu1 }
 0x18f   :  { %v789_v1 = vadd.f32 %v788_v0, %v787_v62 }
 0x191   :  { %v609_v2 = vadd.f32 %v789_v1, %v321_v63 }
 0x193   :  { %618 = vst [vmem:[#allocation8 + $0x30] sm:$0x3f] %v609_v2  ;;  %628 = vrot.lane.b32.xlu0 %v609_v2, %s928_s3 }
 0x1ac   :  { %v537_v7 = vpop.f32.mrf.mxu0 }
 0x1ad   :  { %v538_v8 = vadd.f32 %v537_v7, %v313_v5 }
 0x1ae   :  { %v539_v10 = vpop.f32.mrf.mxu0 }
 0x1af   :  { %616 = vst [vmem:[#allocation8 + $0x20] sm:$0x3f] %v538_v8  ;;  %v540_v11 = vadd.f32 %v539_v10, %v317_v6 }
 0x1b1   :  { %617 = vst [vmem:[#allocation8 + $0x28] sm:$0x3f] %v540_v11 }
 0x205   :  { %v629_v13 = vpop.permute.xlu0 %628 }
 0x206   :  { %793 = vmatpush3.msk.msra.mxu1 %vm634_vm1, %v629_v13 }
 0x207   :  { %795 = vmatmul.mubr.msk.f32.vlgmr.msra.gmra.mxu1 %vm630_vm2, %v619_v12 }
 0x208   :  { %864 = shalt.err (!%p861_p0)
}
 0x209   :  { %728 = dma.vmem_to_hbm [thread:$0]  %s726_s21, 896, %s1018_s7, [#allocation9]  }
 0x20a   :  { %s873_s4 = scalar_lea.vmem %s716_s23, 256  ;;  %p878_p2 = scmp.lt.s32.totalorder %s716_s23, %s716_s23 }
 0x20b   :  { %p874_p1 = scmp.ne.s32.totalorder %s716_s23, %s873_s4  ;;  %p879_p3 = scmp.lt.s32.totalorder %s873_s4, %s873_s4 }
 0x20d   :  { %p880_p4 = por %p879_p3, %p878_p2 }
 0x20f   :  { %p881_p5 = pnand %p880_p4, %p874_p1 }
 0x211   :  { %884 = shalt.err (!%p881_p5)
}
 0x212   :  { %718 = dma.vmem_to_hbm [thread:$0]  %s716_s23, 256, %s1017_s6, [#allocation4]   ;;  %v752_v14 = vld [vmem:[%s1016_s5] ss:$0 sm:$0xff]  ;;  %vm707_vm3 = vcmask 17408  }
 0x213   :  { %s931_s9 = smov [#allocation10]  }
 0x214   :  { %s735_s10 = sshll.u32 %s931_s9, 4  ;;  %s736_s10 = int_to_ptr.vmem [resolvable:$true] %s735_s10 }
 0x215   :  { %s893_s7 = scalar_lea.vmem %s736_s10, 32  ;;  %p898_p7 = scmp.lt.s32.totalorder %s736_s10, %s736_s10 }
 0x216   :  { %p894_p6 = scmp.ne.s32.totalorder %s736_s10, %s893_s7  ;;  %p899_p8 = scmp.lt.s32.totalorder %s893_s7, %s893_s7 }
 0x218   :  { %p900_p9 = por %p899_p8, %p898_p7 }
 0x21a   :  { %p901_p10 = pnand %p900_p9, %p894_p6 }
 0x2c7   :  { %v703_v15 = vpop.f32.mrf.mxu1 }
 0x2c8   :  { %v704_v16 = vadd.f32 %v752_v14, %v703_v15 }
 0x2c9   :  { %v796_v17 = vpop.f32.mrf.mxu1 }
 0x2ca   :  { %708 = vst.msk [vmem:[#allocation10] sm:$0x3] %vm707_vm3, %v704_v16 }
 0x2cb   :  { %904 = shalt.err (!%p901_p10)
}
 0x2cc   :  { %738 = dma.vmem_to_hbm [thread:$0]  %s736_s10, 32, %s1019_s8, [#allocation9]  }
 0x2cd   :  { %917 = dma.done.wait [#allocation4], 256  }
 0x2ce   :  { %918 = vsyncadd [#allocation4], 4294967040 }
 0x2cf   :  { %919 = dma.done.wait [#allocation9], 928  }
 0x2d0   :  { %920 = vsyncadd [#allocation9], 4294966368 }
 0x2d1   :  { %748 = vsyncpa [#allocation3], 1 }
 0x2d2   :  { %749 = vsyncpa [#allocation6], 1 }
 0x2d3   :  { %750 = vsyncpa [#allocation4], 1 }
 0x2d4   :  { %751 = vsyncpa [#allocation9], 1 }

</bundles_post_ra>
